<compile_context>
chip_gen: v5e
topology: v5e:2x2
jax: 0.10.0
libtpu: 0.0.40
codegen_flags: <defaults>
</compile_context>

<pallas_src>
import functools

import jax
import jax.numpy as jnp
from jax.experimental import pallas as pl
from jax.experimental.pallas import tpu as pltpu


def _cdiv(a, b):
    return -(-a // b)


def _round_up(x, m):
    return _cdiv(x, m) * m


def _sublane_pack(dtype):
    # Rows packed per sublane group: 8 for 4-byte, 16 for 2-byte, 32 for 1-byte.
    itemsize = jnp.dtype(dtype).itemsize
    return 8 * max(1, 4 // itemsize)


def _pick_lane_block(lanes, max_lanes):
    """Block size along the lane (last) axis.

    Small/medium axes are taken whole (block dim == full dim is always legal).
    Large axes get the biggest 128-multiple <= max_lanes, preferring an exact
    divisor (unmasked edge) when the axis itself is 128-aligned; otherwise the
    single partial edge block is masked by Pallas.
    """
    if lanes <= max_lanes:
        return lanes
    best = max(128, (max_lanes // 128) * 128)
    if lanes % 128 == 0:
        b = best
        while b >= 128:
            if lanes % b == 0:
                return b
            b -= 128
    return best


def _vmem_capacity_bytes():
    try:
        return int(pltpu.get_tpu_info().vmem_capacity_bytes)
    except Exception:
        return 64 << 20  # conservative fallback (v7x per-core VMEM)


def _tlu_kernel(x_ref, tau_ref, o_ref):
    # x_ref/o_ref: (row_block, lane_block)
    # tau_ref:     (row_block, 1)  [layout A]  or  (1, lane_block)  [layout B]
    o_ref[...] = jnp.maximum(x_ref[...], tau_ref[...])


@functools.partial(
    jax.jit,
    static_argnames=("target_tile_bytes", "max_lanes", "tiny_bypass_bytes"),
)
def tlu_forward(x, tau, *, target_tile_bytes=4 << 20, max_lanes=4096,
                tiny_bypass_bytes=1 << 20):
    """x: (N, C, H, W); tau: (1, C, 1, 1).  Returns max(x, tau) in x's dtype."""
    n, c, h, w = x.shape
    hw = h * w
    dtype = x.dtype
    itemsize = jnp.dtype(dtype).itemsize
    pack = _sublane_pack(dtype)

    tau_b = tau.astype(dtype)
    total_bytes = n * c * hw * itemsize

    # Tiny inputs: fixed pallas_call overhead + lost XLA fusion would dominate.
    if total_bytes < tiny_bypass_bytes:
        return jnp.maximum(x, tau_b)

    # ---- choose the 2-D streaming layout -----------------------------------
    fold_channels = (hw % 128 != 0) and ((c * hw) % 128 == 0)
    if fold_channels:
        rows, lanes = n, c * hw          # lanes = C*H*W : lane-dense again
    else:
        rows, lanes = n * c, hw          # one (n, c) pair per row
    x2d = x.reshape(rows, lanes)

    # ---- tile sizing (generation-aware VMEM clamp) --------------------------
    vmem_cap = _vmem_capacity_bytes()
    # 2 x (input + output) double buffers must stay under ~half physical VMEM.
    tile_budget = max(pack * 128 * itemsize, min(target_tile_bytes, vmem_cap // 8))

    lane_block = _pick_lane_block(lanes, max_lanes)
    lane_pad = _round_up(lane_block, 128)          # VMEM lane padding
    row_block = max(pack, (tile_budget // (lane_pad * itemsize)) // pack * pack)
    if row_block >= rows:
        row_block = rows                            # full dim: always legal

    grid_rows = _cdiv(rows, row_block)
    grid_cols = _cdiv(lanes, lane_block)

    # v7x megacore: expose at least two parallel grid steps for real work.
    if grid_rows * grid_cols == 1 and total_bytes > (2 << 20):
        if rows > pack:
            row_block = max(pack, _round_up(_cdiv(rows, 2), pack))
            grid_rows = _cdiv(rows, row_block)
        elif lane_block >= 256:
            lane_block = max(128, _round_up(_cdiv(lane_block, 2), 128))
            lane_pad = _round_up(lane_block, 128)
            grid_cols = _cdiv(lanes, lane_block)

    # ---- tau plumbing (blocked specs only; no resident column) --------------
    if fold_channels:
        tau2d = jnp.broadcast_to(tau_b.reshape(c, 1), (c, hw)).reshape(1, lanes)
        tau_spec = pl.BlockSpec((1, lane_block), lambda i, j: (0, j))
        tau_tile_vmem = pack * lane_pad * itemsize      # sublane-padded
    else:
        tau2d = jnp.broadcast_to(tau_b.reshape(1, c), (n, c)).reshape(rows, 1)
        tau_spec = pl.BlockSpec((row_block, 1), lambda i, j: (i, 0))
        tau_tile_vmem = _round_up(row_block, pack) * 128 * itemsize  # lane-padded

    # ---- VMEM budget / compiler params --------------------------------------
    row_pad = _round_up(row_block, pack)
    tile_vmem = row_pad * lane_pad * itemsize
    vmem_estimate = 4 * tile_vmem + 2 * tau_tile_vmem   # 2 bufs x (in + out) + tau
    vmem_limit = None
    if vmem_estimate > (12 << 20):
        vmem_limit = int(min(vmem_estimate + (4 << 20), int(vmem_cap * 0.9)))

    compiler_params = pltpu.CompilerParams(
        dimension_semantics=("parallel", "parallel"),
        vmem_limit_bytes=vmem_limit,
    )

    cost = pl.CostEstimate(
        flops=rows * lanes,  # one max per element
        transcendentals=0,
        bytes_accessed=2 * rows * lanes * itemsize + c * itemsize,
    )

    out2d = pl.pallas_call(
        _tlu_kernel,
        out_shape=jax.ShapeDtypeStruct((rows, lanes), dtype),
        grid_spec=pltpu.PrefetchScalarGridSpec(
            num_scalar_prefetch=0,
            grid=(grid_rows, grid_cols),
            in_specs=[
                pl.BlockSpec((row_block, lane_block), lambda i, j: (i, j)),
                tau_spec,
            ],
            out_specs=pl.BlockSpec((row_block, lane_block), lambda i, j: (i, j)),
        ),
        compiler_params=compiler_params,
        cost_estimate=cost,
    )(x2d, tau2d)

    return out2d.reshape(n, c, h, w)


if __name__ == "__main__":
    k0, k1, k2 = jax.random.split(jax.random.PRNGKey(0), 3)

    # Small demo shape consistent with the module.
    N, C, H, W = 2, 4, 16, 16
    x = jax.random.normal(k0, (N, C, H, W), dtype=jnp.float32)
    tau = jnp.zeros((1, C, 1, 1), dtype=jnp.float32)  # module init: zeros

    # tiny_bypass_bytes=0 forces the Pallas path at this small demo shape.
    out = tlu_forward(x, tau, tiny_bypass_bytes=0)
    jax.block_until_ready(out)
    assert out.shape == x.shape and out.dtype == x.dtype
    assert jnp.allclose(out, jnp.maximum(x, tau)), "TLU mismatch (zero tau)"

    # Non-zero per-channel thresholds (layout A: lanes = H*W, 128-aligned).
    tau2 = (jnp.arange(C, dtype=jnp.float32).reshape(1, C, 1, 1) - 1.5) * 0.3
    out2 = tlu_forward(x, tau2, tiny_bypass_bytes=0)
    jax.block_until_ready(out2)
    assert jnp.allclose(out2, jnp.maximum(x, tau2)), "TLU mismatch (nonzero tau)"

    # Channel-folded layout B (7x7 feature map, C*H*W multiple of 128).
    N3, C3, H3, W3 = 2, 128, 7, 7
    x3 = jax.random.normal(k1, (N3, C3, H3, W3), dtype=jnp.float32)
    tau3 = jax.random.normal(k2, (1, C3, 1, 1), dtype=jnp.float32) * 0.1
    out3 = tlu_forward(x3, tau3, tiny_bypass_bytes=0)
    jax.block_until_ready(out3)
    assert jnp.allclose(out3, jnp.maximum(x3, tau3)), "TLU mismatch (folded layout)"

    # Bypass path (default threshold) still matches the reference.
    out4 = tlu_forward(x, tau2)
    jax.block_until_ready(out4)
    assert jnp.allclose(out4, jnp.maximum(x, tau2)), "TLU mismatch (bypass path)"

    print("KERNEL_OK")
</pallas_src>

<mosaic_0001>
module attributes {stable_mosaic.version = 11 : i64} {
  func.func @_tlu_kernel(%arg0: i32, %arg1: i32, %arg2: memref<8x256xf32, #tpu.memory_space<vmem>>, %arg3: memref<8x1xf32, #tpu.memory_space<vmem>>, %arg4: memref<8x256xf32, #tpu.memory_space<vmem>>) attributes {dimension_semantics = [#tpu.dimension_semantics<parallel>, #tpu.dimension_semantics<parallel>], iteration_bounds = array<i64: 1, 1>, scalar_prefetch = 0 : i64, scratch_operands = 0 : i64, tpu.core_type = #tpu.core_type<tc>, window_params = [{transform_indices = @transform_0, window_bounds = array<i64: 8, 256>}, {transform_indices = @transform_1, window_bounds = array<i64: 8, 1>}, {transform_indices = @transform_2, window_bounds = array<i64: 8, 256>}]} {
    %c0 = arith.constant 0 : index
    %c0_0 = arith.constant 0 : index
    %0 = vector.load %arg2[%c0, %c0_0] : memref<8x256xf32, #tpu.memory_space<vmem>>, vector<8x256xf32>
    %c0_1 = arith.constant 0 : index
    %c0_2 = arith.constant 0 : index
    %1 = vector.load %arg3[%c0_1, %c0_2] : memref<8x1xf32, #tpu.memory_space<vmem>>, vector<8x1xf32>
    %2 = vector.broadcast %1 : vector<8x1xf32> to vector<8x256xf32>
    %3 = arith.maximumf %0, %2 : vector<8x256xf32>
    %c0_3 = arith.constant 0 : index
    %c0_4 = arith.constant 0 : index
    %4 = vector.load %arg4[%c0_3, %c0_4] : memref<8x256xf32, #tpu.memory_space<vmem>>, vector<8x256xf32>
    tpu.vector_store %arg4[%c0_3, %c0_4], %3 {strides = array<i32>} : memref<8x256xf32, #tpu.memory_space<vmem>>, vector<8x256xf32>,
    return
  }
  func.func @transform_0(%arg0: i32, %arg1: i32) -> (i32, i32) {
    %c0_i32 = arith.constant 0 : i32
    return %arg0, %arg1 : i32, i32
  }
  func.func @transform_1(%arg0: i32, %arg1: i32) -> (i32, i32) {
    %c0_i32 = arith.constant 0 : i32
    %c0_i32_0 = arith.constant 0 : i32
    return %arg0, %c0_i32 : i32, i32
  }
  func.func @transform_2(%arg0: i32, %arg1: i32) -> (i32, i32) {
    %c0_i32 = arith.constant 0 : i32
    return %arg0, %arg1 : i32, i32
  }
}

</mosaic_0001>

<bundles_post_ra>
// kernel: tlu_forward.1
= control target key start
LH: loop header
LB: loop body
LE: loop exit
PB: predicated region body
PF: predicated region fallthrough
CT: control target
= control target key end

     0   :  { %v29_v0 = vmov 0   ;;  %s60_s1 = inlined_call_operand.vmem [shape: f32[8,1], index: 1, kind: input, shape index: {}]   ;;  %s61_s0 = inlined_call_operand.vmem [shape: f32[8,256], index: 0, kind: input, shape index: {}]   ;;  %s62_s2 = inlined_call_operand.vmem [shape: f32[8,256], index: 2, kind: output, shape index: {}]  }
   0x1   :  { %28 = vset.pattern.permute.xlu0 %v29_v0  ;;  %v13_v1 = vld [vmem:[%s60_s1] sm:$0xff]  ;;  %v12_v3 = vld [vmem:[%s61_s0 + $0x8] sm:$0xff] }
   0x2   :  { %16 = vperm.xlu0 %28, %v13_v1   ;;  %v11_v2 = vld [vmem:[%s61_s0] sm:$0xff] }
  0x74   :  { %v17_v4 = vpop.permute.xlu0 %16 }
  0x75   :  { %v19_v5 = vmax.f32 %v11_v2, %v17_v4  ;;  %v20_v6 = vmax.f32 %v12_v3, %v17_v4 }
  0x77   :  { %21 = vst [vmem:[%s62_s2] sm:$0xff] %v19_v5 }
  0x78   :  { %22 = vst [vmem:[%s62_s2 + $0x8] sm:$0xff] %v20_v6 }

</bundles_post_ra>
